<compile_context>
chip_gen: v7x
topology: tpu7x:2x2x1
jax: 0.10.0
libtpu: 0.0.40
codegen_flags: <defaults>
</compile_context>

<pallas_src>
import functools

import jax
import jax.numpy as jnp
from jax import lax
from jax.experimental import pallas as pl
from jax.experimental.pallas import tpu as pltpu


def _chol_orth_kernel(x_ref, o_ref, *, n, eps):
    f32 = jnp.float32
    x = x_ref[...]                                    # (Bb, N, M), native dtype

    # In-kernel index helpers (traced iota — NOT captured numpy constants).
    idx_n = lax.broadcasted_iota(jnp.int32, (n, 1), 0)                    # (N, 1)
    eye = (lax.broadcasted_iota(jnp.int32, (n, n), 0) ==
           lax.broadcasted_iota(jnp.int32, (n, n), 1)).astype(f32)        # (N, N)

    # ---- Gram matrix on the MXU with f32 accumulation: S = X X^T + eps*I. ----
    s = jnp.einsum("bnm,bkm->bnk", x, x, preferred_element_type=f32)      # (Bb, N, N) f32
    s = s + f32(eps) * eye[None]

    # ---- Re-layout to batch-in-lanes: column c of S as an (N, Bb) tile. ----
    # S is symmetric, so the row slice equals the column slice; only cheap 2-D transposes needed.
    a_cols = [jnp.transpose(s[:, c, :], (1, 0)) for c in range(n)]        # n x (N, Bb)

    # ---- Right-looking Cholesky, fully unrolled (N small & static), batch in lanes. ----
    # NOTE: if a pivot is <= 0 (S not numerically PD despite eps), rsqrt yields inf/NaN and the
    # output is NaN — the same failure mode as torch.linalg.cholesky.
    # TODO(synk): switch the unrolled loops to lax.fori_loop / blocked panels if N grows beyond ~32.
    l_cols, inv_diag = [], []
    for j in range(n):
        col = a_cols[j]                               # (N, Bb); rows < j hold stale partial values,
                                                      # zeroed by `keep` before any use
        inv_d = lax.rsqrt(col[j:j + 1, :])            # (1, Bb) = 1 / L[j, j]   (EUP rsqrt)
        keep = (idx_n >= j).astype(f32)               # (N, 1)
        lcol = col * inv_d * keep                     # (N, Bb) = L[:, j], zero above the diagonal
        l_cols.append(lcol)
        inv_diag.append(inv_d)
        for c in range(j + 1, n):                     # rank-1 Schur update on live columns only
            a_cols[c] = a_cols[c] - lcol * lcol[c:c + 1, :]

    # ---- Forward solve L @ Linv = I, row by row, pure VPU (no tiny serial MXU matmuls). ----
    linv_rows = []                                    # row i of L^{-1}: (N, Bb)
    for i in range(n):
        rhs = (idx_n == i).astype(f32)                # e_i, (N, 1) — broadcasts over the batch lanes
        acc = None
        for k in range(i):
            term = l_cols[k][i:i + 1, :] * linv_rows[k]        # L[i, k] * Linv[k, :]
            acc = term if acc is None else acc + term
        if acc is not None:
            rhs = rhs - acc
        linv_rows.append(rhs * inv_diag[i])           # (N, Bb)

    # ---- Back to batched layout and one dense MXU matmul: W = L^{-1} X. ----
    linv = jnp.stack([jnp.transpose(r, (1, 0)) for r in linv_rows], axis=1)   # (Bb, N, N) f32
    w = jnp.einsum("bij,bjm->bim", linv.astype(x.dtype), x,
                   preferred_element_type=f32)
    o_ref[...] = w.astype(o_ref.dtype)


def _pick_batch_block(b, n, m, itemsize):
    """Largest divisor of b giving blocks of at most ~2 MiB and >= ~8 grid steps when possible."""
    bytes_per_group = max(1, n * m * itemsize)
    max_by_bytes = max(1, (2 << 20) // bytes_per_group)   # keep per-step blocks modest
    max_by_steps = max(1, b // 8)                         # aim for >= 8 grid steps (>= 2 when b >= 2)
    cap = max(1, min(b, max_by_bytes, max_by_steps))
    for bb in range(cap, 0, -1):
        if b % bb == 0:
            return bb
    return 1


def batched_cholesky_orthogonalization(x, weight_shape, *, eps=1e-5, batch_block=None):
    """x: (B, N, M). Orthogonalizes the rows of every (N, M) matrix, reshapes to weight_shape."""
    b, n, m = x.shape

    if batch_block is None:
        batch_block = _pick_batch_block(b, n, m, x.dtype.itemsize)
    assert b % batch_block == 0, (b, batch_block)
    grid = (b // batch_block,)

    # VMEM budget: 2x(in block) + 2x(out block) double-buffered + f32 temporaries, with margin.
    block_bytes = batch_block * n * m * x.dtype.itemsize
    vmem_limit = int(min(max(8 * block_bytes + (4 << 20), 16 << 20), 48 << 20))

    kernel = functools.partial(_chol_orth_kernel, n=n, eps=eps)
    w = pl.pallas_call(
        kernel,
        out_shape=jax.ShapeDtypeStruct((b, n, m), x.dtype),
        grid=grid,
        in_specs=[pl.BlockSpec((batch_block, n, m), lambda i: (i, 0, 0))],
        out_specs=pl.BlockSpec((batch_block, n, m), lambda i: (i, 0, 0)),
        compiler_params=pltpu.CompilerParams(
            dimension_semantics=("parallel",),
            vmem_limit_bytes=vmem_limit,
        ),
    )(x)
    return w.reshape(weight_shape)


def _reference(x, eps=1e-5):
    # pure-JAX reference of the PyTorch forward
    s = jnp.einsum("bnm,bkm->bnk", x, x) + eps * jnp.eye(x.shape[1], dtype=x.dtype)[None]
    l = jnp.linalg.cholesky(s)
    solve = jax.vmap(lambda lo, rhs: jax.scipy.linalg.solve_triangular(lo, rhs, lower=True))
    return solve(l, x)


if __name__ == "__main__":
    key = jax.random.PRNGKey(0)
    # e.g. conv weight (16, 2, 4, 4) with groups=2 -> batched matrices (2, 8, 32)
    groups, out_per_group, cols = 2, 8, 32
    weight_shape = (16, 2, 4, 4)
    x = jax.random.normal(key, (groups, out_per_group, cols), dtype=jnp.float32)

    w = batched_cholesky_orthogonalization(x, weight_shape)
    w = jax.block_until_ready(w)
    assert w.shape == weight_shape, w.shape

    w_ref = _reference(x).reshape(weight_shape)
    err = float(jnp.max(jnp.abs(w - w_ref)))
    assert jnp.allclose(w, w_ref, atol=1e-3, rtol=1e-3), err

    print("KERNEL_OK")
</pallas_src>

<mosaic_0001>
module attributes {stable_mosaic.version = 11 : i64} {
  func.func @_chol_orth_kernel(%arg0: i32, %arg1: memref<1x8x32xf32, #tpu.memory_space<vmem>>, %arg2: memref<1x8x32xf32, #tpu.memory_space<vmem>>) attributes {dimension_semantics = [#tpu.dimension_semantics<parallel>], iteration_bounds = array<i64: 2>, scalar_prefetch = 0 : i64, scratch_operands = 0 : i64, tpu.core_type = #tpu.core_type<tc>, window_params = [{transform_indices = @transform_0, window_bounds = array<i64: 1, 8, 32>}, {transform_indices = @transform_1, window_bounds = array<i64: 1, 8, 32>}]} {
    %c0 = arith.constant 0 : index
    %c0_0 = arith.constant 0 : index
    %c0_1 = arith.constant 0 : index
    %0 = vector.load %arg1[%c0, %c0_0, %c0_1] : memref<1x8x32xf32, #tpu.memory_space<vmem>>, vector<1x8x32xf32>
    %1 = tpu.iota {dimensions = array<i32: 0>} : vector<8x1xi32>
    %2 = tpu.iota {dimensions = array<i32: 0>} : vector<8x8xi32>
    %3 = tpu.iota {dimensions = array<i32: 1>} : vector<8x8xi32>
    %4 = arith.cmpi eq, %2, %3 : vector<8x8xi32>
    %5 = arith.extui %4 : vector<8x8xi1> to vector<8x8xi32>
    %6 = arith.sitofp %5 : vector<8x8xi32> to vector<8x8xf32>
    "tpu.trace_start"() <{level = 10 : i32, message = "bnm,bkm->bnk"}> : () -> ()
    %cst = arith.constant dense<0.000000e+00> : vector<1x8x8xf32>
    %7 = tpu.matmul %0, %0, %cst {dimension_numbers = #tpu.dot_dimension_numbers<[2], [2], [1], [1], [0, 0, 0, 1, 1, 1], [0], [0]>} : vector<1x8x32xf32>, vector<1x8x32xf32>, vector<1x8x8xf32> -> vector<1x8x8xf32>
    "tpu.trace_stop"() : () -> ()
    %8 = vector.shape_cast %6 : vector<8x8xf32> to vector<1x8x8xf32>
    %cst_2 = arith.constant 9.99999974E-6 : f32
    %9 = vector.broadcast %cst_2 : f32 to vector<1x8x8xf32>
    %10 = arith.mulf %9, %8 : vector<1x8x8xf32>
    %11 = arith.addf %7, %10 : vector<1x8x8xf32>
    %12 = vector.extract_strided_slice %11 {offsets = [0, 0, 0], sizes = [1, 1, 8], strides = [1, 1, 1]} : vector<1x8x8xf32> to vector<1x1x8xf32>
    %13 = vector.shape_cast %12 : vector<1x1x8xf32> to vector<1x8xf32>
    %14 = tpu.transpose %13, [1, 0] : vector<1x8xf32> -> vector<8x1xf32>
    %15 = vector.extract_strided_slice %11 {offsets = [0, 1, 0], sizes = [1, 1, 8], strides = [1, 1, 1]} : vector<1x8x8xf32> to vector<1x1x8xf32>
    %16 = vector.shape_cast %15 : vector<1x1x8xf32> to vector<1x8xf32>
    %17 = tpu.transpose %16, [1, 0] : vector<1x8xf32> -> vector<8x1xf32>
    %18 = vector.extract_strided_slice %11 {offsets = [0, 2, 0], sizes = [1, 1, 8], strides = [1, 1, 1]} : vector<1x8x8xf32> to vector<1x1x8xf32>
    %19 = vector.shape_cast %18 : vector<1x1x8xf32> to vector<1x8xf32>
    %20 = tpu.transpose %19, [1, 0] : vector<1x8xf32> -> vector<8x1xf32>
    %21 = vector.extract_strided_slice %11 {offsets = [0, 3, 0], sizes = [1, 1, 8], strides = [1, 1, 1]} : vector<1x8x8xf32> to vector<1x1x8xf32>
    %22 = vector.shape_cast %21 : vector<1x1x8xf32> to vector<1x8xf32>
    %23 = tpu.transpose %22, [1, 0] : vector<1x8xf32> -> vector<8x1xf32>
    %24 = vector.extract_strided_slice %11 {offsets = [0, 4, 0], sizes = [1, 1, 8], strides = [1, 1, 1]} : vector<1x8x8xf32> to vector<1x1x8xf32>
    %25 = vector.shape_cast %24 : vector<1x1x8xf32> to vector<1x8xf32>
    %26 = tpu.transpose %25, [1, 0] : vector<1x8xf32> -> vector<8x1xf32>
    %27 = vector.extract_strided_slice %11 {offsets = [0, 5, 0], sizes = [1, 1, 8], strides = [1, 1, 1]} : vector<1x8x8xf32> to vector<1x1x8xf32>
    %28 = vector.shape_cast %27 : vector<1x1x8xf32> to vector<1x8xf32>
    %29 = tpu.transpose %28, [1, 0] : vector<1x8xf32> -> vector<8x1xf32>
    %30 = vector.extract_strided_slice %11 {offsets = [0, 6, 0], sizes = [1, 1, 8], strides = [1, 1, 1]} : vector<1x8x8xf32> to vector<1x1x8xf32>
    %31 = vector.shape_cast %30 : vector<1x1x8xf32> to vector<1x8xf32>
    %32 = tpu.transpose %31, [1, 0] : vector<1x8xf32> -> vector<8x1xf32>
    %33 = vector.extract_strided_slice %11 {offsets = [0, 7, 0], sizes = [1, 1, 8], strides = [1, 1, 1]} : vector<1x8x8xf32> to vector<1x1x8xf32>
    %34 = vector.shape_cast %33 : vector<1x1x8xf32> to vector<1x8xf32>
    %35 = tpu.transpose %34, [1, 0] : vector<1x8xf32> -> vector<8x1xf32>
    %36 = vector.extract_strided_slice %14 {offsets = [0, 0], sizes = [1, 1], strides = [1, 1]} : vector<8x1xf32> to vector<1x1xf32>
    %37 = math.rsqrt %36 : vector<1x1xf32>
    %c0_i32 = arith.constant 0 : i32
    %38 = vector.broadcast %c0_i32 : i32 to vector<8x1xi32>
    %39 = arith.cmpi sge, %1, %38 : vector<8x1xi32>
    %40 = arith.extui %39 : vector<8x1xi1> to vector<8x1xi32>
    %41 = arith.sitofp %40 : vector<8x1xi32> to vector<8x1xf32>
    %42 = vector.broadcast %37 : vector<1x1xf32> to vector<8x1xf32>
    %43 = arith.mulf %14, %42 : vector<8x1xf32>
    %44 = arith.mulf %43, %41 : vector<8x1xf32>
    %45 = vector.extract_strided_slice %44 {offsets = [1, 0], sizes = [1, 1], strides = [1, 1]} : vector<8x1xf32> to vector<1x1xf32>
    %46 = vector.broadcast %45 : vector<1x1xf32> to vector<8x1xf32>
    %47 = arith.mulf %44, %46 : vector<8x1xf32>
    %48 = arith.subf %17, %47 : vector<8x1xf32>
    %49 = vector.extract_strided_slice %44 {offsets = [2, 0], sizes = [1, 1], strides = [1, 1]} : vector<8x1xf32> to vector<1x1xf32>
    %50 = vector.broadcast %49 : vector<1x1xf32> to vector<8x1xf32>
    %51 = arith.mulf %44, %50 : vector<8x1xf32>
    %52 = arith.subf %20, %51 : vector<8x1xf32>
    %53 = vector.extract_strided_slice %44 {offsets = [3, 0], sizes = [1, 1], strides = [1, 1]} : vector<8x1xf32> to vector<1x1xf32>
    %54 = vector.broadcast %53 : vector<1x1xf32> to vector<8x1xf32>
    %55 = arith.mulf %44, %54 : vector<8x1xf32>
    %56 = arith.subf %23, %55 : vector<8x1xf32>
    %57 = vector.extract_strided_slice %44 {offsets = [4, 0], sizes = [1, 1], strides = [1, 1]} : vector<8x1xf32> to vector<1x1xf32>
    %58 = vector.broadcast %57 : vector<1x1xf32> to vector<8x1xf32>
    %59 = arith.mulf %44, %58 : vector<8x1xf32>
    %60 = arith.subf %26, %59 : vector<8x1xf32>
    %61 = vector.extract_strided_slice %44 {offsets = [5, 0], sizes = [1, 1], strides = [1, 1]} : vector<8x1xf32> to vector<1x1xf32>
    %62 = vector.broadcast %61 : vector<1x1xf32> to vector<8x1xf32>
    %63 = arith.mulf %44, %62 : vector<8x1xf32>
    %64 = arith.subf %29, %63 : vector<8x1xf32>
    %65 = vector.extract_strided_slice %44 {offsets = [6, 0], sizes = [1, 1], strides = [1, 1]} : vector<8x1xf32> to vector<1x1xf32>
    %66 = vector.broadcast %65 : vector<1x1xf32> to vector<8x1xf32>
    %67 = arith.mulf %44, %66 : vector<8x1xf32>
    %68 = arith.subf %32, %67 : vector<8x1xf32>
    %69 = vector.extract_strided_slice %44 {offsets = [7, 0], sizes = [1, 1], strides = [1, 1]} : vector<8x1xf32> to vector<1x1xf32>
    %70 = vector.broadcast %69 : vector<1x1xf32> to vector<8x1xf32>
    %71 = arith.mulf %44, %70 : vector<8x1xf32>
    %72 = arith.subf %35, %71 : vector<8x1xf32>
    %73 = vector.extract_strided_slice %48 {offsets = [1, 0], sizes = [1, 1], strides = [1, 1]} : vector<8x1xf32> to vector<1x1xf32>
    %74 = math.rsqrt %73 : vector<1x1xf32>
    %c1_i32 = arith.constant 1 : i32
    %75 = vector.broadcast %c1_i32 : i32 to vector<8x1xi32>
    %76 = arith.cmpi sge, %1, %75 : vector<8x1xi32>
    %77 = arith.extui %76 : vector<8x1xi1> to vector<8x1xi32>
    %78 = arith.sitofp %77 : vector<8x1xi32> to vector<8x1xf32>
    %79 = vector.broadcast %74 : vector<1x1xf32> to vector<8x1xf32>
    %80 = arith.mulf %48, %79 : vector<8x1xf32>
    %81 = arith.mulf %80, %78 : vector<8x1xf32>
    %82 = vector.extract_strided_slice %81 {offsets = [2, 0], sizes = [1, 1], strides = [1, 1]} : vector<8x1xf32> to vector<1x1xf32>
    %83 = vector.broadcast %82 : vector<1x1xf32> to vector<8x1xf32>
    %84 = arith.mulf %81, %83 : vector<8x1xf32>
    %85 = arith.subf %52, %84 : vector<8x1xf32>
    %86 = vector.extract_strided_slice %81 {offsets = [3, 0], sizes = [1, 1], strides = [1, 1]} : vector<8x1xf32> to vector<1x1xf32>
    %87 = vector.broadcast %86 : vector<1x1xf32> to vector<8x1xf32>
    %88 = arith.mulf %81, %87 : vector<8x1xf32>
    %89 = arith.subf %56, %88 : vector<8x1xf32>
    %90 = vector.extract_strided_slice %81 {offsets = [4, 0], sizes = [1, 1], strides = [1, 1]} : vector<8x1xf32> to vector<1x1xf32>
    %91 = vector.broadcast %90 : vector<1x1xf32> to vector<8x1xf32>
    %92 = arith.mulf %81, %91 : vector<8x1xf32>
    %93 = arith.subf %60, %92 : vector<8x1xf32>
    %94 = vector.extract_strided_slice %81 {offsets = [5, 0], sizes = [1, 1], strides = [1, 1]} : vector<8x1xf32> to vector<1x1xf32>
    %95 = vector.broadcast %94 : vector<1x1xf32> to vector<8x1xf32>
    %96 = arith.mulf %81, %95 : vector<8x1xf32>
    %97 = arith.subf %64, %96 : vector<8x1xf32>
    %98 = vector.extract_strided_slice %81 {offsets = [6, 0], sizes = [1, 1], strides = [1, 1]} : vector<8x1xf32> to vector<1x1xf32>
    %99 = vector.broadcast %98 : vector<1x1xf32> to vector<8x1xf32>
    %100 = arith.mulf %81, %99 : vector<8x1xf32>
    %101 = arith.subf %68, %100 : vector<8x1xf32>
    %102 = vector.extract_strided_slice %81 {offsets = [7, 0], sizes = [1, 1], strides = [1, 1]} : vector<8x1xf32> to vector<1x1xf32>
    %103 = vector.broadcast %102 : vector<1x1xf32> to vector<8x1xf32>
    %104 = arith.mulf %81, %103 : vector<8x1xf32>
    %105 = arith.subf %72, %104 : vector<8x1xf32>
    %106 = vector.extract_strided_slice %85 {offsets = [2, 0], sizes = [1, 1], strides = [1, 1]} : vector<8x1xf32> to vector<1x1xf32>
    %107 = math.rsqrt %106 : vector<1x1xf32>
    %c2_i32 = arith.constant 2 : i32
    %108 = vector.broadcast %c2_i32 : i32 to vector<8x1xi32>
    %109 = arith.cmpi sge, %1, %108 : vector<8x1xi32>
    %110 = arith.extui %109 : vector<8x1xi1> to vector<8x1xi32>
    %111 = arith.sitofp %110 : vector<8x1xi32> to vector<8x1xf32>
    %112 = vector.broadcast %107 : vector<1x1xf32> to vector<8x1xf32>
    %113 = arith.mulf %85, %112 : vector<8x1xf32>
    %114 = arith.mulf %113, %111 : vector<8x1xf32>
    %115 = vector.extract_strided_slice %114 {offsets = [3, 0], sizes = [1, 1], strides = [1, 1]} : vector<8x1xf32> to vector<1x1xf32>
    %116 = vector.broadcast %115 : vector<1x1xf32> to vector<8x1xf32>
    %117 = arith.mulf %114, %116 : vector<8x1xf32>
    %118 = arith.subf %89, %117 : vector<8x1xf32>
    %119 = vector.extract_strided_slice %114 {offsets = [4, 0], sizes = [1, 1], strides = [1, 1]} : vector<8x1xf32> to vector<1x1xf32>
    %120 = vector.broadcast %119 : vector<1x1xf32> to vector<8x1xf32>
    %121 = arith.mulf %114, %120 : vector<8x1xf32>
    %122 = arith.subf %93, %121 : vector<8x1xf32>
    %123 = vector.extract_strided_slice %114 {offsets = [5, 0], sizes = [1, 1], strides = [1, 1]} : vector<8x1xf32> to vector<1x1xf32>
    %124 = vector.broadcast %123 : vector<1x1xf32> to vector<8x1xf32>
    %125 = arith.mulf %114, %124 : vector<8x1xf32>
    %126 = arith.subf %97, %125 : vector<8x1xf32>
    %127 = vector.extract_strided_slice %114 {offsets = [6, 0], sizes = [1, 1], strides = [1, 1]} : vector<8x1xf32> to vector<1x1xf32>
    %128 = vector.broadcast %127 : vector<1x1xf32> to vector<8x1xf32>
    %129 = arith.mulf %114, %128 : vector<8x1xf32>
    %130 = arith.subf %101, %129 : vector<8x1xf32>
    %131 = vector.extract_strided_slice %114 {offsets = [7, 0], sizes = [1, 1], strides = [1, 1]} : vector<8x1xf32> to vector<1x1xf32>
    %132 = vector.broadcast %131 : vector<1x1xf32> to vector<8x1xf32>
    %133 = arith.mulf %114, %132 : vector<8x1xf32>
    %134 = arith.subf %105, %133 : vector<8x1xf32>
    %135 = vector.extract_strided_slice %118 {offsets = [3, 0], sizes = [1, 1], strides = [1, 1]} : vector<8x1xf32> to vector<1x1xf32>
    %136 = math.rsqrt %135 : vector<1x1xf32>
    %c3_i32 = arith.constant 3 : i32
    %137 = vector.broadcast %c3_i32 : i32 to vector<8x1xi32>
    %138 = arith.cmpi sge, %1, %137 : vector<8x1xi32>
    %139 = arith.extui %138 : vector<8x1xi1> to vector<8x1xi32>
    %140 = arith.sitofp %139 : vector<8x1xi32> to vector<8x1xf32>
    %141 = vector.broadcast %136 : vector<1x1xf32> to vector<8x1xf32>
    %142 = arith.mulf %118, %141 : vector<8x1xf32>
    %143 = arith.mulf %142, %140 : vector<8x1xf32>
    %144 = vector.extract_strided_slice %143 {offsets = [4, 0], sizes = [1, 1], strides = [1, 1]} : vector<8x1xf32> to vector<1x1xf32>
    %145 = vector.broadcast %144 : vector<1x1xf32> to vector<8x1xf32>
    %146 = arith.mulf %143, %145 : vector<8x1xf32>
    %147 = arith.subf %122, %146 : vector<8x1xf32>
    %148 = vector.extract_strided_slice %143 {offsets = [5, 0], sizes = [1, 1], strides = [1, 1]} : vector<8x1xf32> to vector<1x1xf32>
    %149 = vector.broadcast %148 : vector<1x1xf32> to vector<8x1xf32>
    %150 = arith.mulf %143, %149 : vector<8x1xf32>
    %151 = arith.subf %126, %150 : vector<8x1xf32>
    %152 = vector.extract_strided_slice %143 {offsets = [6, 0], sizes = [1, 1], strides = [1, 1]} : vector<8x1xf32> to vector<1x1xf32>
    %153 = vector.broadcast %152 : vector<1x1xf32> to vector<8x1xf32>
    %154 = arith.mulf %143, %153 : vector<8x1xf32>
    %155 = arith.subf %130, %154 : vector<8x1xf32>
    %156 = vector.extract_strided_slice %143 {offsets = [7, 0], sizes = [1, 1], strides = [1, 1]} : vector<8x1xf32> to vector<1x1xf32>
    %157 = vector.broadcast %156 : vector<1x1xf32> to vector<8x1xf32>
    %158 = arith.mulf %143, %157 : vector<8x1xf32>
    %159 = arith.subf %134, %158 : vector<8x1xf32>
    %160 = vector.extract_strided_slice %147 {offsets = [4, 0], sizes = [1, 1], strides = [1, 1]} : vector<8x1xf32> to vector<1x1xf32>
    %161 = math.rsqrt %160 : vector<1x1xf32>
    %c4_i32 = arith.constant 4 : i32
    %162 = vector.broadcast %c4_i32 : i32 to vector<8x1xi32>
    %163 = arith.cmpi sge, %1, %162 : vector<8x1xi32>
    %164 = arith.extui %163 : vector<8x1xi1> to vector<8x1xi32>
    %165 = arith.sitofp %164 : vector<8x1xi32> to vector<8x1xf32>
    %166 = vector.broadcast %161 : vector<1x1xf32> to vector<8x1xf32>
    %167 = arith.mulf %147, %166 : vector<8x1xf32>
    %168 = arith.mulf %167, %165 : vector<8x1xf32>
    %169 = vector.extract_strided_slice %168 {offsets = [5, 0], sizes = [1, 1], strides = [1, 1]} : vector<8x1xf32> to vector<1x1xf32>
    %170 = vector.broadcast %169 : vector<1x1xf32> to vector<8x1xf32>
    %171 = arith.mulf %168, %170 : vector<8x1xf32>
    %172 = arith.subf %151, %171 : vector<8x1xf32>
    %173 = vector.extract_strided_slice %168 {offsets = [6, 0], sizes = [1, 1], strides = [1, 1]} : vector<8x1xf32> to vector<1x1xf32>
    %174 = vector.broadcast %173 : vector<1x1xf32> to vector<8x1xf32>
    %175 = arith.mulf %168, %174 : vector<8x1xf32>
    %176 = arith.subf %155, %175 : vector<8x1xf32>
    %177 = vector.extract_strided_slice %168 {offsets = [7, 0], sizes = [1, 1], strides = [1, 1]} : vector<8x1xf32> to vector<1x1xf32>
    %178 = vector.broadcast %177 : vector<1x1xf32> to vector<8x1xf32>
    %179 = arith.mulf %168, %178 : vector<8x1xf32>
    %180 = arith.subf %159, %179 : vector<8x1xf32>
    %181 = vector.extract_strided_slice %172 {offsets = [5, 0], sizes = [1, 1], strides = [1, 1]} : vector<8x1xf32> to vector<1x1xf32>
    %182 = math.rsqrt %181 : vector<1x1xf32>
    %c5_i32 = arith.constant 5 : i32
    %183 = vector.broadcast %c5_i32 : i32 to vector<8x1xi32>
    %184 = arith.cmpi sge, %1, %183 : vector<8x1xi32>
    %185 = arith.extui %184 : vector<8x1xi1> to vector<8x1xi32>
    %186 = arith.sitofp %185 : vector<8x1xi32> to vector<8x1xf32>
    %187 = vector.broadcast %182 : vector<1x1xf32> to vector<8x1xf32>
    %188 = arith.mulf %172, %187 : vector<8x1xf32>
    %189 = arith.mulf %188, %186 : vector<8x1xf32>
    %190 = vector.extract_strided_slice %189 {offsets = [6, 0], sizes = [1, 1], strides = [1, 1]} : vector<8x1xf32> to vector<1x1xf32>
    %191 = vector.broadcast %190 : vector<1x1xf32> to vector<8x1xf32>
    %192 = arith.mulf %189, %191 : vector<8x1xf32>
    %193 = arith.subf %176, %192 : vector<8x1xf32>
    %194 = vector.extract_strided_slice %189 {offsets = [7, 0], sizes = [1, 1], strides = [1, 1]} : vector<8x1xf32> to vector<1x1xf32>
    %195 = vector.broadcast %194 : vector<1x1xf32> to vector<8x1xf32>
    %196 = arith.mulf %189, %195 : vector<8x1xf32>
    %197 = arith.subf %180, %196 : vector<8x1xf32>
    %198 = vector.extract_strided_slice %193 {offsets = [6, 0], sizes = [1, 1], strides = [1, 1]} : vector<8x1xf32> to vector<1x1xf32>
    %199 = math.rsqrt %198 : vector<1x1xf32>
    %c6_i32 = arith.constant 6 : i32
    %200 = vector.broadcast %c6_i32 : i32 to vector<8x1xi32>
    %201 = arith.cmpi sge, %1, %200 : vector<8x1xi32>
    %202 = arith.extui %201 : vector<8x1xi1> to vector<8x1xi32>
    %203 = arith.sitofp %202 : vector<8x1xi32> to vector<8x1xf32>
    %204 = vector.broadcast %199 : vector<1x1xf32> to vector<8x1xf32>
    %205 = arith.mulf %193, %204 : vector<8x1xf32>
    %206 = arith.mulf %205, %203 : vector<8x1xf32>
    %207 = vector.extract_strided_slice %206 {offsets = [7, 0], sizes = [1, 1], strides = [1, 1]} : vector<8x1xf32> to vector<1x1xf32>
    %208 = vector.broadcast %207 : vector<1x1xf32> to vector<8x1xf32>
    %209 = arith.mulf %206, %208 : vector<8x1xf32>
    %210 = arith.subf %197, %209 : vector<8x1xf32>
    %211 = vector.extract_strided_slice %210 {offsets = [7, 0], sizes = [1, 1], strides = [1, 1]} : vector<8x1xf32> to vector<1x1xf32>
    %212 = math.rsqrt %211 : vector<1x1xf32>
    %c0_i32_3 = arith.constant 0 : i32
    %213 = vector.broadcast %c0_i32_3 : i32 to vector<8x1xi32>
    %214 = arith.cmpi eq, %1, %213 : vector<8x1xi32>
    %215 = arith.extui %214 : vector<8x1xi1> to vector<8x1xi32>
    %216 = arith.sitofp %215 : vector<8x1xi32> to vector<8x1xf32>
    %217 = vector.broadcast %37 : vector<1x1xf32> to vector<8x1xf32>
    %218 = arith.mulf %216, %217 : vector<8x1xf32>
    %c1_i32_4 = arith.constant 1 : i32
    %219 = vector.broadcast %c1_i32_4 : i32 to vector<8x1xi32>
    %220 = arith.cmpi eq, %1, %219 : vector<8x1xi32>
    %221 = arith.extui %220 : vector<8x1xi1> to vector<8x1xi32>
    %222 = arith.sitofp %221 : vector<8x1xi32> to vector<8x1xf32>
    %223 = vector.extract_strided_slice %44 {offsets = [1, 0], sizes = [1, 1], strides = [1, 1]} : vector<8x1xf32> to vector<1x1xf32>
    %224 = vector.broadcast %223 : vector<1x1xf32> to vector<8x1xf32>
    %225 = arith.mulf %224, %218 : vector<8x1xf32>
    %226 = arith.subf %222, %225 : vector<8x1xf32>
    %227 = vector.broadcast %74 : vector<1x1xf32> to vector<8x1xf32>
    %228 = arith.mulf %226, %227 : vector<8x1xf32>
    %c2_i32_5 = arith.constant 2 : i32
    %229 = vector.broadcast %c2_i32_5 : i32 to vector<8x1xi32>
    %230 = arith.cmpi eq, %1, %229 : vector<8x1xi32>
    %231 = arith.extui %230 : vector<8x1xi1> to vector<8x1xi32>
    %232 = arith.sitofp %231 : vector<8x1xi32> to vector<8x1xf32>
    %233 = vector.extract_strided_slice %44 {offsets = [2, 0], sizes = [1, 1], strides = [1, 1]} : vector<8x1xf32> to vector<1x1xf32>
    %234 = vector.broadcast %233 : vector<1x1xf32> to vector<8x1xf32>
    %235 = arith.mulf %234, %218 : vector<8x1xf32>
    %236 = vector.extract_strided_slice %81 {offsets = [2, 0], sizes = [1, 1], strides = [1, 1]} : vector<8x1xf32> to vector<1x1xf32>
    %237 = vector.broadcast %236 : vector<1x1xf32> to vector<8x1xf32>
    %238 = arith.mulf %237, %228 : vector<8x1xf32>
    %239 = arith.addf %235, %238 : vector<8x1xf32>
    %240 = arith.subf %232, %239 : vector<8x1xf32>
    %241 = vector.broadcast %107 : vector<1x1xf32> to vector<8x1xf32>
    %242 = arith.mulf %240, %241 : vector<8x1xf32>
    %c3_i32_6 = arith.constant 3 : i32
    %243 = vector.broadcast %c3_i32_6 : i32 to vector<8x1xi32>
    %244 = arith.cmpi eq, %1, %243 : vector<8x1xi32>
    %245 = arith.extui %244 : vector<8x1xi1> to vector<8x1xi32>
    %246 = arith.sitofp %245 : vector<8x1xi32> to vector<8x1xf32>
    %247 = vector.extract_strided_slice %44 {offsets = [3, 0], sizes = [1, 1], strides = [1, 1]} : vector<8x1xf32> to vector<1x1xf32>
    %248 = vector.broadcast %247 : vector<1x1xf32> to vector<8x1xf32>
    %249 = arith.mulf %248, %218 : vector<8x1xf32>
    %250 = vector.extract_strided_slice %81 {offsets = [3, 0], sizes = [1, 1], strides = [1, 1]} : vector<8x1xf32> to vector<1x1xf32>
    %251 = vector.broadcast %250 : vector<1x1xf32> to vector<8x1xf32>
    %252 = arith.mulf %251, %228 : vector<8x1xf32>
    %253 = arith.addf %249, %252 : vector<8x1xf32>
    %254 = vector.extract_strided_slice %114 {offsets = [3, 0], sizes = [1, 1], strides = [1, 1]} : vector<8x1xf32> to vector<1x1xf32>
    %255 = vector.broadcast %254 : vector<1x1xf32> to vector<8x1xf32>
    %256 = arith.mulf %255, %242 : vector<8x1xf32>
    %257 = arith.addf %253, %256 : vector<8x1xf32>
    %258 = arith.subf %246, %257 : vector<8x1xf32>
    %259 = vector.broadcast %136 : vector<1x1xf32> to vector<8x1xf32>
    %260 = arith.mulf %258, %259 : vector<8x1xf32>
    %c4_i32_7 = arith.constant 4 : i32
    %261 = vector.broadcast %c4_i32_7 : i32 to vector<8x1xi32>
    %262 = arith.cmpi eq, %1, %261 : vector<8x1xi32>
    %263 = arith.extui %262 : vector<8x1xi1> to vector<8x1xi32>
    %264 = arith.sitofp %263 : vector<8x1xi32> to vector<8x1xf32>
    %265 = vector.extract_strided_slice %44 {offsets = [4, 0], sizes = [1, 1], strides = [1, 1]} : vector<8x1xf32> to vector<1x1xf32>
    %266 = vector.broadcast %265 : vector<1x1xf32> to vector<8x1xf32>
    %267 = arith.mulf %266, %218 : vector<8x1xf32>
    %268 = vector.extract_strided_slice %81 {offsets = [4, 0], sizes = [1, 1], strides = [1, 1]} : vector<8x1xf32> to vector<1x1xf32>
    %269 = vector.broadcast %268 : vector<1x1xf32> to vector<8x1xf32>
    %270 = arith.mulf %269, %228 : vector<8x1xf32>
    %271 = arith.addf %267, %270 : vector<8x1xf32>
    %272 = vector.extract_strided_slice %114 {offsets = [4, 0], sizes = [1, 1], strides = [1, 1]} : vector<8x1xf32> to vector<1x1xf32>
    %273 = vector.broadcast %272 : vector<1x1xf32> to vector<8x1xf32>
    %274 = arith.mulf %273, %242 : vector<8x1xf32>
    %275 = arith.addf %271, %274 : vector<8x1xf32>
    %276 = vector.extract_strided_slice %143 {offsets = [4, 0], sizes = [1, 1], strides = [1, 1]} : vector<8x1xf32> to vector<1x1xf32>
    %277 = vector.broadcast %276 : vector<1x1xf32> to vector<8x1xf32>
    %278 = arith.mulf %277, %260 : vector<8x1xf32>
    %279 = arith.addf %275, %278 : vector<8x1xf32>
    %280 = arith.subf %264, %279 : vector<8x1xf32>
    %281 = vector.broadcast %161 : vector<1x1xf32> to vector<8x1xf32>
    %282 = arith.mulf %280, %281 : vector<8x1xf32>
    %c5_i32_8 = arith.constant 5 : i32
    %283 = vector.broadcast %c5_i32_8 : i32 to vector<8x1xi32>
    %284 = arith.cmpi eq, %1, %283 : vector<8x1xi32>
    %285 = arith.extui %284 : vector<8x1xi1> to vector<8x1xi32>
    %286 = arith.sitofp %285 : vector<8x1xi32> to vector<8x1xf32>
    %287 = vector.extract_strided_slice %44 {offsets = [5, 0], sizes = [1, 1], strides = [1, 1]} : vector<8x1xf32> to vector<1x1xf32>
    %288 = vector.broadcast %287 : vector<1x1xf32> to vector<8x1xf32>
    %289 = arith.mulf %288, %218 : vector<8x1xf32>
    %290 = vector.extract_strided_slice %81 {offsets = [5, 0], sizes = [1, 1], strides = [1, 1]} : vector<8x1xf32> to vector<1x1xf32>
    %291 = vector.broadcast %290 : vector<1x1xf32> to vector<8x1xf32>
    %292 = arith.mulf %291, %228 : vector<8x1xf32>
    %293 = arith.addf %289, %292 : vector<8x1xf32>
    %294 = vector.extract_strided_slice %114 {offsets = [5, 0], sizes = [1, 1], strides = [1, 1]} : vector<8x1xf32> to vector<1x1xf32>
    %295 = vector.broadcast %294 : vector<1x1xf32> to vector<8x1xf32>
    %296 = arith.mulf %295, %242 : vector<8x1xf32>
    %297 = arith.addf %293, %296 : vector<8x1xf32>
    %298 = vector.extract_strided_slice %143 {offsets = [5, 0], sizes = [1, 1], strides = [1, 1]} : vector<8x1xf32> to vector<1x1xf32>
    %299 = vector.broadcast %298 : vector<1x1xf32> to vector<8x1xf32>
    %300 = arith.mulf %299, %260 : vector<8x1xf32>
    %301 = arith.addf %297, %300 : vector<8x1xf32>
    %302 = vector.extract_strided_slice %168 {offsets = [5, 0], sizes = [1, 1], strides = [1, 1]} : vector<8x1xf32> to vector<1x1xf32>
    %303 = vector.broadcast %302 : vector<1x1xf32> to vector<8x1xf32>
    %304 = arith.mulf %303, %282 : vector<8x1xf32>
    %305 = arith.addf %301, %304 : vector<8x1xf32>
    %306 = arith.subf %286, %305 : vector<8x1xf32>
    %307 = vector.broadcast %182 : vector<1x1xf32> to vector<8x1xf32>
    %308 = arith.mulf %306, %307 : vector<8x1xf32>
    %c6_i32_9 = arith.constant 6 : i32
    %309 = vector.broadcast %c6_i32_9 : i32 to vector<8x1xi32>
    %310 = arith.cmpi eq, %1, %309 : vector<8x1xi32>
    %311 = arith.extui %310 : vector<8x1xi1> to vector<8x1xi32>
    %312 = arith.sitofp %311 : vector<8x1xi32> to vector<8x1xf32>
    %313 = vector.extract_strided_slice %44 {offsets = [6, 0], sizes = [1, 1], strides = [1, 1]} : vector<8x1xf32> to vector<1x1xf32>
    %314 = vector.broadcast %313 : vector<1x1xf32> to vector<8x1xf32>
    %315 = arith.mulf %314, %218 : vector<8x1xf32>
    %316 = vector.extract_strided_slice %81 {offsets = [6, 0], sizes = [1, 1], strides = [1, 1]} : vector<8x1xf32> to vector<1x1xf32>
    %317 = vector.broadcast %316 : vector<1x1xf32> to vector<8x1xf32>
    %318 = arith.mulf %317, %228 : vector<8x1xf32>
    %319 = arith.addf %315, %318 : vector<8x1xf32>
    %320 = vector.extract_strided_slice %114 {offsets = [6, 0], sizes = [1, 1], strides = [1, 1]} : vector<8x1xf32> to vector<1x1xf32>
    %321 = vector.broadcast %320 : vector<1x1xf32> to vector<8x1xf32>
    %322 = arith.mulf %321, %242 : vector<8x1xf32>
    %323 = arith.addf %319, %322 : vector<8x1xf32>
    %324 = vector.extract_strided_slice %143 {offsets = [6, 0], sizes = [1, 1], strides = [1, 1]} : vector<8x1xf32> to vector<1x1xf32>
    %325 = vector.broadcast %324 : vector<1x1xf32> to vector<8x1xf32>
    %326 = arith.mulf %325, %260 : vector<8x1xf32>
    %327 = arith.addf %323, %326 : vector<8x1xf32>
    %328 = vector.extract_strided_slice %168 {offsets = [6, 0], sizes = [1, 1], strides = [1, 1]} : vector<8x1xf32> to vector<1x1xf32>
    %329 = vector.broadcast %328 : vector<1x1xf32> to vector<8x1xf32>
    %330 = arith.mulf %329, %282 : vector<8x1xf32>
    %331 = arith.addf %327, %330 : vector<8x1xf32>
    %332 = vector.extract_strided_slice %189 {offsets = [6, 0], sizes = [1, 1], strides = [1, 1]} : vector<8x1xf32> to vector<1x1xf32>
    %333 = vector.broadcast %332 : vector<1x1xf32> to vector<8x1xf32>
    %334 = arith.mulf %333, %308 : vector<8x1xf32>
    %335 = arith.addf %331, %334 : vector<8x1xf32>
    %336 = arith.subf %312, %335 : vector<8x1xf32>
    %337 = vector.broadcast %199 : vector<1x1xf32> to vector<8x1xf32>
    %338 = arith.mulf %336, %337 : vector<8x1xf32>
    %c7_i32 = arith.constant 7 : i32
    %339 = vector.broadcast %c7_i32 : i32 to vector<8x1xi32>
    %340 = arith.cmpi eq, %1, %339 : vector<8x1xi32>
    %341 = arith.extui %340 : vector<8x1xi1> to vector<8x1xi32>
    %342 = arith.sitofp %341 : vector<8x1xi32> to vector<8x1xf32>
    %343 = vector.extract_strided_slice %44 {offsets = [7, 0], sizes = [1, 1], strides = [1, 1]} : vector<8x1xf32> to vector<1x1xf32>
    %344 = vector.broadcast %343 : vector<1x1xf32> to vector<8x1xf32>
    %345 = arith.mulf %344, %218 : vector<8x1xf32>
    %346 = vector.extract_strided_slice %81 {offsets = [7, 0], sizes = [1, 1], strides = [1, 1]} : vector<8x1xf32> to vector<1x1xf32>
    %347 = vector.broadcast %346 : vector<1x1xf32> to vector<8x1xf32>
    %348 = arith.mulf %347, %228 : vector<8x1xf32>
    %349 = arith.addf %345, %348 : vector<8x1xf32>
    %350 = vector.extract_strided_slice %114 {offsets = [7, 0], sizes = [1, 1], strides = [1, 1]} : vector<8x1xf32> to vector<1x1xf32>
    %351 = vector.broadcast %350 : vector<1x1xf32> to vector<8x1xf32>
    %352 = arith.mulf %351, %242 : vector<8x1xf32>
    %353 = arith.addf %349, %352 : vector<8x1xf32>
    %354 = vector.extract_strided_slice %143 {offsets = [7, 0], sizes = [1, 1], strides = [1, 1]} : vector<8x1xf32> to vector<1x1xf32>
    %355 = vector.broadcast %354 : vector<1x1xf32> to vector<8x1xf32>
    %356 = arith.mulf %355, %260 : vector<8x1xf32>
    %357 = arith.addf %353, %356 : vector<8x1xf32>
    %358 = vector.extract_strided_slice %168 {offsets = [7, 0], sizes = [1, 1], strides = [1, 1]} : vector<8x1xf32> to vector<1x1xf32>
    %359 = vector.broadcast %358 : vector<1x1xf32> to vector<8x1xf32>
    %360 = arith.mulf %359, %282 : vector<8x1xf32>
    %361 = arith.addf %357, %360 : vector<8x1xf32>
    %362 = vector.extract_strided_slice %189 {offsets = [7, 0], sizes = [1, 1], strides = [1, 1]} : vector<8x1xf32> to vector<1x1xf32>
    %363 = vector.broadcast %362 : vector<1x1xf32> to vector<8x1xf32>
    %364 = arith.mulf %363, %308 : vector<8x1xf32>
    %365 = arith.addf %361, %364 : vector<8x1xf32>
    %366 = vector.extract_strided_slice %206 {offsets = [7, 0], sizes = [1, 1], strides = [1, 1]} : vector<8x1xf32> to vector<1x1xf32>
    %367 = vector.broadcast %366 : vector<1x1xf32> to vector<8x1xf32>
    %368 = arith.mulf %367, %338 : vector<8x1xf32>
    %369 = arith.addf %365, %368 : vector<8x1xf32>
    %370 = arith.subf %342, %369 : vector<8x1xf32>
    %371 = vector.broadcast %212 : vector<1x1xf32> to vector<8x1xf32>
    %372 = arith.mulf %370, %371 : vector<8x1xf32>
    %373 = tpu.transpose %218, [1, 0] : vector<8x1xf32> -> vector<1x8xf32>
    %374 = tpu.transpose %228, [1, 0] : vector<8x1xf32> -> vector<1x8xf32>
    %375 = tpu.transpose %242, [1, 0] : vector<8x1xf32> -> vector<1x8xf32>
    %376 = tpu.transpose %260, [1, 0] : vector<8x1xf32> -> vector<1x8xf32>
    %377 = tpu.transpose %282, [1, 0] : vector<8x1xf32> -> vector<1x8xf32>
    %378 = tpu.transpose %308, [1, 0] : vector<8x1xf32> -> vector<1x8xf32>
    %379 = tpu.transpose %338, [1, 0] : vector<8x1xf32> -> vector<1x8xf32>
    %380 = tpu.transpose %372, [1, 0] : vector<8x1xf32> -> vector<1x8xf32>
    %381 = vector.shape_cast %373 : vector<1x8xf32> to vector<1x1x8xf32>
    %382 = vector.shape_cast %374 : vector<1x8xf32> to vector<1x1x8xf32>
    %383 = vector.shape_cast %375 : vector<1x8xf32> to vector<1x1x8xf32>
    %384 = vector.shape_cast %376 : vector<1x8xf32> to vector<1x1x8xf32>
    %385 = vector.shape_cast %377 : vector<1x8xf32> to vector<1x1x8xf32>
    %386 = vector.shape_cast %378 : vector<1x8xf32> to vector<1x1x8xf32>
    %387 = vector.shape_cast %379 : vector<1x8xf32> to vector<1x1x8xf32>
    %388 = vector.shape_cast %380 : vector<1x8xf32> to vector<1x1x8xf32>
    %389 = tpu.concatenate %381, %382, %383, %384, %385, %386, %387, %388 in 1 : vector<1x1x8xf32>, vector<1x1x8xf32>, vector<1x1x8xf32>, vector<1x1x8xf32>, vector<1x1x8xf32>, vector<1x1x8xf32>, vector<1x1x8xf32>, vector<1x1x8xf32> -> vector<1x8x8xf32>
    "tpu.trace_start"() <{level = 10 : i32, message = "bij,bjm->bim"}> : () -> ()
    %cst_10 = arith.constant dense<0.000000e+00> : vector<1x8x32xf32>
    %390 = tpu.matmul %389, %0, %cst_10 {dimension_numbers = #tpu.dot_dimension_numbers<[2], [1], [1], [2], [0, 0, 0, 1, 1, 2], [0], [0]>} : vector<1x8x8xf32>, vector<1x8x32xf32>, vector<1x8x32xf32> -> vector<1x8x32xf32>
    "tpu.trace_stop"() : () -> ()
    %c0_11 = arith.constant 0 : index
    %c0_12 = arith.constant 0 : index
    %c0_13 = arith.constant 0 : index
    %391 = vector.load %arg2[%c0_11, %c0_12, %c0_13] : memref<1x8x32xf32, #tpu.memory_space<vmem>>, vector<1x8x32xf32>
    tpu.vector_store %arg2[%c0_11, %c0_12, %c0_13], %390 {strides = array<i32>} : memref<1x8x32xf32, #tpu.memory_space<vmem>>, vector<1x8x32xf32>,
    return
  }
  func.func @transform_0(%arg0: i32) -> (i32, i32, i32) {
    %c0_i32 = arith.constant 0 : i32
    %c0_i32_0 = arith.constant 0 : i32
    %c0_i32_1 = arith.constant 0 : i32
    return %arg0, %c0_i32, %c0_i32_0 : i32, i32, i32
  }
  func.func @transform_1(%arg0: i32) -> (i32, i32, i32) {
    %c0_i32 = arith.constant 0 : i32
    %c0_i32_0 = arith.constant 0 : i32
    %c0_i32_1 = arith.constant 0 : i32
    return %arg0, %c0_i32, %c0_i32_0 : i32, i32, i32
  }
}

</mosaic_0001>

<bundles_post_ra>
// kernel: tpu_custom_call.1
= control target key start
LH: loop header
LB: loop body
LE: loop exit
PB: predicated region body
PF: predicated region fallthrough
CT: control target
= control target key end

     0   :  { %6 = vsyncpa [#allocation3], 0  ;;  %s1839_s0 = inlined_call_operand.hbm [shape: f32[2,8,32], index: 0, kind: input, shape index: {}]   ;;  %s1840_s1 = inlined_call_operand.hbm [shape: f32[2,8,32], index: 1, kind: output, shape index: {}]  }
   0x1   :  { %8 = vsyncpa [#allocation3 + $0x1], 0 }
   0x2   :  { %9 = vsyncpa [#allocation4], 0 }
   0x3   :  { %11 = vsyncpa [#allocation4 + $0x1], 0  ;;  %s1487_s6 = smov 0   ;;  %s1489_s7 = smov 0  }
   0x4   :  { %s1491_s8 = smov 0   ;;  %s1493_s9 = smov 0  }
   0x5 LB: > { %s1508_s10 = sadd.s32 4294967295, %s1471_s9   ;;  %s1267_s11 = sadd.s32 4294967294, %s1471_s9   ;;  %s1471_s9 = sphi %s1493_s9, %s1855_s9   ;;  %s1467_s8 = sphi %s1491_s8, %s1854_s8   ;;  %s1463_s7 = sphi %s1489_s7, %s1853_s7   ;;  %s1459_s6 = sphi %s1487_s6, %s1852_s6  }
   0x6   : > { %s1512_s12 = sadd.s32 1, %s1471_s9   ;;  %s24_s13 = sadd.s32 1, %s1467_s8 }
   0x7   : > { %s21_s14 = ssub.s32 %s1471_s9, %s1512_s12  ;;  %p31_p0 = scmp.ne.s32.totalorder %s1467_s8, %s1463_s7 }
   0x8   : > { %p22_p1 = scmp.eq.s32.totalorder %s21_s14, 0  ;;  %p32_p2 = scmp.eq.s32.totalorder %s1471_s9, 0 }
   0x9   : > { %p37_p3 = scmp.ne.s32.totalorder %s1463_s7, %s1459_s6  ;;  %p38_p4 = scmp.eq.s32.totalorder %s1508_s10, 0 }
   0xa   : > { %s1524_s15 = scalar_select %p22_p1, %s1467_s8, %s24_s13  }
   0xb   : > { %p1526_p5 = por %p32_p2, %p31_p0  ;;  %p1530_p6 = por %p38_p4, %p37_p3 }
   0xc   : > { %p61_p7 = scmp.eq.s32.totalorder %s1508_s10, 1  ;;  %p67_p8 = scmp.eq.s32.totalorder %s1267_s11, 1 }
   0xd   : > { %p1323_p10 = scmp.lt.s32.totalorder %s1471_s9, 2  ;;  %s87_s20 = sand.u32 1, %s1467_s8  }
   0xe   : > { %p1537_p11 = por %p61_p7, %p31_p0  ;;  %p1541_p12 = por %p67_p8, %p37_p3 }
   0xf   : > { %s1271_s21 = sshll.u32 %s1471_s9, 7  ;;  %s1270_s22 = sshll.u32 %s87_s20, 3 }
  0x10   : > { %s1844_s18 = scalar_select %p1537_p11, 1, 0 }
  0x11   : > { %s1845_s19 = scalar_select %p1541_p12, 1, 0 }
  0x12   : > { %s1550_s25 = scalar_lea.hbm %s1839_s0, %s1271_s21  ;;  %s91_s26 = scalar_lea.vmem [#allocation2], %s1270_s22 }
  0x13   : > { %s98_s27 = sshll.u32 %s91_s26, 4  ;;  %p1554_p13 = pnand %p1323_p10, %p1526_p5  ;;  %s1558_s27 = int_to_ptr.vmem [resolvable:$true] %s98_s27 }
  0x14   : > { %s88_s29 = scalar_lea.sflag [#allocation3], %s87_s20  ;;  %s1375_s30 = scalar_lea.hbm %s1550_s25, 128 }
  0x15   : > { %p1376_p2 = scmp.ne.s32.totalorder %s1550_s25, %s1375_s30  ;;  %p1377_p3 = pneg %p1554_p13 }
  0x16   : > { %s1380_s4 = scalar_lea.hbm %s1839_s0, 256  ;;  %p1381_p5 = scmp.lt.u32.totalorder %s1550_s25, %s1839_s0 }
  0x17   : > { %p1378_p4 = pnand %p1377_p3, %p1376_p2  ;;  %p1382_p8 = scmp.lt.u32.totalorder %s1380_s4, %s1375_s30 }
  0x18   : > { %p1384_p9 = scmp.lt.u32.totalorder %s1375_s30, %s1550_s25 }
  0x19   : > { %p1379_p7 = pneg %p1378_p4  ;;  %p1383_p10 = por %p1382_p8, %p1381_p5 }
  0x1b   : > { %p1385_p0 = por %p1384_p9, %p1383_p10 }
  0x1d   : > { %p1386_p1 = pnand %p1385_p0, %p1379_p7 }
  0x1f   : > { %1389 = shalt.err (!%p1386_p1)
}
  0x20   : > { %s1390_s13 = scalar_lea.vmem %s1558_s27, 128  ;;  %s1473_s14 = smov [#allocation2]  }
  0x21   : > { %p1391_p2 = scmp.ne.s32.totalorder %s1558_s27, %s1390_s13  ;;  %s1395_s16 = sshll.u32 %s1473_s14, 4  ;;  %s1396_s16 = int_to_ptr.vmem [resolvable:$false] %s1395_s16 }
  0x22   : > { %s1397_s20 = scalar_lea.vmem %s1396_s16, 256  ;;  %p1398_p11 = scmp.lt.s32.totalorder %s1558_s27, %s1396_s16 }
  0x23   : > { %p1393_p4 = pnand %p1391_p2, %p1377_p3  ;;  %p1399_p5 = scmp.lt.s32.totalorder %s1397_s20, %s1390_s13 }
  0x25   : > { %p1394_p12 = pneg %p1393_p4  ;;  %p1400_p8 = por %p1399_p5, %p1398_p11 }
  0x27   : > { %p1401_p9 = pnand %p1400_p8, %p1394_p12 }
  0x29   : > { %1404 = shalt.err (!%p1401_p9)
}
  0x2a   : > { %1318 = dma.hbm_to_vmem [thread:$0]  (!%p1554_p13), %s1550_s25, 128, %s1558_s27, %s88_s29  }
  0x2b   : > { %p1847_p0 = scmp.lt.s32.totalorder %s1471_s9, 3  ;;  %p1848_p1 = scmp.ge.s32.totalorder %s1471_s9, 1 }
  0x2d   : > { %p104_p3 = pnand %p1848_p1, %p1847_p0 }
  0x2e   : > { %s1592_s21 = sand.u32 (!%p104_p3), 1, %s1463_s7  }
  0x2f   : > { %107 = sbr.rel (%p104_p3) target bundleno = 936 (0x3a8), region = 24  ;;  %s1273_s22 = sshll.u32 (!%p104_p3), %s1592_s21, 3 }
  0x30   : > { %s110_s23 = scalar_lea.sflag (!%p104_p3), [#allocation3], %s1592_s21  ;;  %s113_s24 = scalar_lea.vmem (!%p104_p3), [#allocation2], %s1273_s22 }
  0x36   : > { %1450 = dma.done.wait (%p1530_p6), %s110_s23, 128  }
  0x37   : > { %1452 = vsyncadd (%p1530_p6), %s110_s23, 4294967168  ;;  %v1474_v0 = vmov 0.0   ;;  %vm1475_vm0 = vmmov 0   ;;  %vm141_vm1 = vcmask 261120   ;;  %v132_v1 = vld [vmem:[%s113_s24] sm:$0xff]  ;;  %v133_v2 = vlaneseq  ;;  %s1294_s17 = sshll.u32 %s1508_s10, 7 }
  0x38   : > { %1301 = vmatprep.subr.mxu0 %v1474_v0  ;;  %1303 = vmatprep.mubr.msk.f32.mxu0 %vm1475_vm0, %v1474_v0  ;;  %s131_s25 = scalar_lea.vmem [#allocation5], %s1273_s22  ;;  %s1794_s29 = scalar_lea.hbm %s1840_s1, %s1294_s17 }
  0x39   : > { %1306 = vmatprep.subr.mxu1 %v1474_v0  ;;  %1308 = vmatprep.mubr.msk.f32.mxu1 %vm1475_vm0, %v1474_v0  ;;  %v1608_v3 = vshrl.u32 %v133_v2, 7  ;;  %v136_v4 = vand.u32 127, %v133_v2  ;;  %s1197_s26 = sshll.u32 %s131_s25, 4  ;;  %s1184_s30 = scalar_lea.sflag [#allocation4], %s1592_s21  ;;  %s1796_s26 = int_to_ptr.vmem [resolvable:$true] %s1197_s26 }
  0x3a   : > { %1302 = vmatpush3.xpose.msk.msra.mxu0 %vm141_vm1, %v132_v1  ;;  %1307 = vmatpush3.msra.mxu1 %v132_v1  ;;  %s1405_s2 = scalar_lea.vmem %s1796_s26, 128  ;;  %p1849_p11 = scmp.ne.s32.totalorder %s1844_s18, 0 }
  0x3b   : > { %vm137_vm2 = vcmp.eq.s32.totalorder %v1608_v3, %v136_v4  ;;  %v492_v18 = vsub.s32 0, %v1608_v3  ;;  %vm725_vm3 = vcmp.eq.s32.totalorder %v1608_v3, 0  ;;  %v498_v22 = vsub.s32 1, %v1608_v3  ;;  %p1406_p6 = scmp.ne.s32.totalorder %s1796_s26, %s1405_s2  ;;  %s1476_s10 = smov [#allocation5]  }
  0x3c   : > { %v1275_v5 = vsel %vm137_vm2, 1.0, %v1474_v0  ;;  %v1284_v20 = vsel %vm725_vm3, 1.0, %v1474_v0  ;;  %v1617_v23 = vsub.s32 5, %v1608_v3  ;;  %v1620_v24 = vsub.s32 4, %v1608_v3  ;;  %s1409_s3 = sshll.u32 %s1476_s10, 4  ;;  %s1410_s3 = int_to_ptr.vmem [resolvable:$false] %s1409_s3 }
  0x3d   : > { %1304 = vmatmul.mubr.msk.f32.vlgmr.msra.gmra.mrb[0].mxu0 %vm141_vm1, %v132_v1  ;;  %v140_v6 = vmul.f32 1e-05, %v1275_v5  ;;  %v1627_v27 = vsub.s32 7, %v1608_v3  ;;  %v1630_v28 = vsub.s32 6, %v1608_v3  ;;  %vm729_vm4 = vcmp.eq.s32.totalorder %v1608_v3, 1  ;;  %p1407_p12 = pnand %p1406_p6, %p1849_p11  ;;  %s1411_s4 = scalar_lea.vmem %s1410_s3, 256 }
  0x3e   : > { %v504_v43 = vsub.s32 2, %v1608_v3  ;;  %v1285_v45 = vsel %vm729_vm4, 1.0, %v1474_v0  ;;  %vm539_vm5 = vcmp.ge.s32.totalorder %v1608_v3, 1  ;;  %vm735_vm6 = vcmp.eq.s32.totalorder %v1608_v3, 2  ;;  %p1412_p7 = scmp.lt.s32.totalorder %s1796_s26, %s1410_s3  ;;  %p1413_p10 = scmp.lt.s32.totalorder %s1411_s4, %s1405_s2 }
  0x3f   : > { %v1278_v51 = vsel %vm539_vm5, 1.0, %v1474_v0  ;;  %vm585_vm7 = vcmp.ge.s32.totalorder %v1608_v3, 2  ;;  %vm743_vm8 = vcmp.eq.s32.totalorder %v1608_v3, 3  ;;  %vm625_vm9 = vcmp.ge.s32.totalorder %v1608_v3, 3  ;;  %p1408_p13 = pneg %p1407_p12 }
  0x40   : > { %vm753_vm10 = vcmp.eq.s32.totalorder %v1608_v3, 4  ;;  %vm659_vm11 = vcmp.ge.s32.totalorder %v1608_v3, 4  ;;  %vm765_vm12 = vcmp.eq.s32.totalorder %v1608_v3, 5  ;;  %vm687_vm13 = vcmp.ge.s32.totalorder %v1608_v3, 5  ;;  %p1414_p2 = por %p1413_p10, %p1412_p7 }
  0x41   : > { %vm779_vm14 = vcmp.eq.s32.totalorder %v1608_v3, 6  ;;  %vm709_vm15 = vcmp.ge.s32.totalorder %v1608_v3, 6  ;;  %vm795_vm0 = vcmp.eq.s32.totalorder %v1608_v3, 7  ;;  %vm1094_vm2 = vcmask 1040384  }
  0x42   : > { %vm1096_vm3 = vcmask 1041408   ;;  %vm1098_vm4 = vcmask 1042432   ;;  %vm1100_vm5 = vcmask 1043456   ;;  %p1415_p4 = pnand %p1414_p2, %p1408_p13 }
 0x110   : > { %v211_v7 = vpop.f32.mrb[0].mxu0 }
 0x111   : > { %v212_v8 = vadd.f32 %v211_v7, %v140_v6  ;;  %v1305_v9 = vpop.f32.mrb[1].mxu0 }
 0x113   : > { %215 = vxpose.xlu0.b32.start.end [1/1] (short) (narrow) %v212_v8, 8  ;;  %v282_v10 = vrot.slane %v212_v8, 2  ;;  %v248_v11 = vrot.slane %v212_v8, 1  ;;  %v316_v12 = vrot.slane %v212_v8, 3  ;;  %v350_v13 = vrot.slane %v212_v8, 4 }
 0x114   : > { %v384_v14 = vrot.slane %v212_v8, 5  ;;  %v418_v15 = vrot.slane %v212_v8, 6  ;;  %v452_v16 = vrot.slane %v212_v8, 7 }
 0x115   : > { %284 = vxpose.xlu1.b32.start.end [1/1] (short) (narrow) %v282_v10, 8 }
 0x117   : > { %250 = vxpose.xlu0.b32.start.end [1/1] (short) (narrow) %v248_v11, 8 }
 0x119   : > { %318 = vxpose.xlu1.b32.start.end [1/1] (short) (narrow) %v316_v12, 8 }
 0x11b   : > { %352 = vxpose.xlu0.b32.start.end [1/1] (short) (narrow) %v350_v13, 8 }
 0x11d   : > { %386 = vxpose.xlu1.b32.start.end [1/1] (short) (narrow) %v384_v14, 8 }
 0x11f   : > { %420 = vxpose.xlu0.b32.start.end [1/1] (short) (narrow) %v418_v15, 8 }
 0x121   : > { %454 = vxpose.xlu1.b32.start.end [1/1] (short) (narrow) %v452_v16, 8 }
 0x193   : > { %v231_v17 = vpop.trf.xlu0 }
 0x194   : > { %1359 = vrsqrt.f32 %v231_v17 }
 0x195   : > { %v300_v39 = vpop.trf.xlu1 }
 0x197   : > { %v266_v36 = vpop.trf.xlu0 }
 0x199   : > { %v1652_v42 = vpop.trf.xlu1 }
 0x19b   : > { %v1665_v56 = vpop.trf.xlu0 }
 0x19d   : > { %v402_v50 = vpop.trf.xlu1 }
 0x19e   : > { %v1360_v19 = vpop.eup %1359 }
 0x19f   : > { %v493_v21 = vrot.slane %v1360_v19, %v492_v18  ;;  %v436_v10 = vpop.trf.xlu0 }
 0x1a1   : > { %v1622_v25 = vmul.f32 %v493_v21, %v231_v17  ;;  %v1624_v26 = vmul.f32 %v1284_v20, %v493_v21  ;;  %v470_v61 = vpop.trf.xlu1 }
 0x1a3   : > { %v499_v29 = vrot.slane %v1622_v25, %v498_v22  ;;  %v523_v30 = vrot.slane %v1622_v25, %v1617_v23  ;;  %817 = vxpose.xlu0.b32.start.end [1/1] (short) (narrow) %v1624_v26, 8  ;;  %v1638_v31 = vrot.slane %v1622_v25, %v1620_v24  ;;  %v535_v32 = vrot.slane %v1622_v25, %v1627_v27 }
 0x1a4   : > { %v529_v33 = vrot.slane %v1622_v25, %v1630_v28  ;;  %v505_v47 = vrot.slane %v1622_v25, %v504_v43 }
 0x1a5   : > { %v500_v34 = vmul.f32 %v499_v29, %v1622_v25  ;;  %v768_v35 = vmul.f32 %v1624_v26, %v523_v30  ;;  %v1648_v37 = vmul.f32 %v1624_v26, %v1638_v31  ;;  %v798_v40 = vmul.f32 %v1624_v26, %v535_v32 }
 0x1a6   : > { %v782_v41 = vmul.f32 %v1624_v26, %v529_v33  ;;  %v732_v44 = vmul.f32 %v1624_v26, %v499_v29  ;;  %v506_v54 = vmul.f32 %v505_v47, %v1622_v25  ;;  %v524_v55 = vmul.f32 %v523_v30, %v1622_v25 }
 0x1a7   : > { %v501_v38 = vsub.f32 %v266_v36, %v500_v34  ;;  %v536_v58 = vmul.f32 %v535_v32, %v1622_v25  ;;  %v530_v5 = vmul.f32 %v529_v33, %v1622_v25  ;;  %v738_v29 = vmul.f32 %v1624_v26, %v505_v47 }
 0x1a8   : > { %v733_v48 = vsub.f32 %v1285_v45, %v732_v44  ;;  %v507_v62 = vsub.f32 %v300_v39, %v506_v54  ;;  %v525_v63 = vsub.f32 %v402_v50, %v524_v55  ;;  %v510_v30 = vsub.s32 3, %v1608_v3 }
 0x1a9   : > { %1361 = vrsqrt.f32 %v501_v38  ;;  %v537_v8 = vsub.f32 %v470_v61, %v536_v58  ;;  %v531_v17 = vsub.f32 %v436_v10, %v530_v5  ;;  %v1286_v33 = vsel %vm735_vm6, 1.0, %v1474_v0 }
 0x1aa   : > { %v511_v34 = vrot.slane %v1622_v25, %v510_v30  ;;  %vm1102_vm6 = vcmask 1044480  }
 0x1b3   : > { %v1362_v46 = vpop.eup %1361 }
 0x1b4   : > { %v545_v49 = vrot.slane %v1362_v46, %v498_v22 }
 0x1b6   : > { %v546_v52 = vmul.f32 %v545_v49, %v501_v38  ;;  %v1661_v53 = vmul.f32 %v733_v48, %v545_v49 }
 0x1b8   : > { %v1667_v57 = vmul.f32 %v1278_v51, %v546_v52  ;;  %849 = vxpose.xlu0.b32.start.end [1/1] (short) (narrow) %v1661_v53, 8 }
 0x1ba   : > { %v551_v59 = vrot.slane %v1667_v57, %v504_v43  ;;  %v569_v60 = vrot.slane %v1667_v57, %v1617_v23  ;;  %v581_v1 = vrot.slane %v1667_v57, %v1627_v27  ;;  %v575_v6 = vrot.slane %v1667_v57, %v1630_v28 }
 0x1bb   : > { %v557_v36 = vrot.slane %v1667_v57, %v510_v30 }
 0x1bc   : > { %v552_v2 = vmul.f32 %v551_v59, %v1667_v57  ;;  %v570_v4 = vmul.f32 %v569_v60, %v1667_v57  ;;  %v769_v7 = vmul.f32 %v1661_v53, %v569_v60  ;;  %v582_v9 = vmul.f32 %v581_v1, %v1667_v57 }
 0x1bd   : > { %v799_v15 = vmul.f32 %v1661_v53, %v581_v1  ;;  %v576_v16 = vmul.f32 %v575_v6, %v1667_v57  ;;  %v783_v18 = vmul.f32 %v1661_v53, %v575_v6  ;;  %v739_v21 = vmul.f32 %v1661_v53, %v551_v59 }
 0x1be   : > { %v553_v11 = vsub.f32 %v507_v62, %v552_v2  ;;  %v1683_v12 = vsub.f32 %v525_v63, %v570_v4  ;;  %v1685_v13 = vadd.f32 %v769_v7, %v768_v35  ;;  %v1687_v14 = vsub.f32 %v537_v8, %v582_v9 }
 0x1bf   : > { %v800_v19 = vadd.f32 %v799_v15, %v798_v40  ;;  %v1692_v20 = vsub.f32 %v531_v17, %v576_v16  ;;  %v784_v22 = vadd.f32 %v783_v18, %v782_v41  ;;  %v740_v32 = vadd.f32 %v739_v21, %v738_v29 }
 0x1c0   : > { %1363 = vrsqrt.f32 %v553_v11  ;;  %v1279_v40 = vsel %vm585_vm7, 1.0, %v1474_v0  ;;  %v512_v41 = vmul.f32 %v511_v34, %v1622_v25  ;;  %v558_v46 = vmul.f32 %v557_v36, %v1667_v57 }
 0x1c1   : > { %v741_v39 = vsub.f32 %v1286_v33, %v740_v32  ;;  %v747_v1 = vmul.f32 %v1661_v53, %v557_v36  ;;  %v746_v2 = vmul.f32 %v1624_v26, %v511_v34  ;;  %v1287_v7 = vsel %vm743_vm8, 1.0, %v1474_v0 }
 0x1c2   : > { %v513_v48 = vsub.f32 %v1652_v42, %v512_v41  ;;  %v563_v8 = vrot.slane %v1667_v57, %v1620_v24  ;;  %v1280_v15 = vsel %vm625_vm9, 1.0, %v1474_v0  ;;  %vm1104_vm7 = vcmask 1045504  }
 0x1c3   : > { %v748_v5 = vadd.f32 %v747_v1, %v746_v2  ;;  %vm1106_vm8 = vcmask 1046528   ;;  %vm1108_vm9 = vcmask 64512  }
 0x1c4   : > { %v559_v51 = vsub.f32 %v513_v48, %v558_v46  ;;  %v564_v17 = vmul.f32 %v563_v8, %v1667_v57  ;;  %v757_v57 = vmul.f32 %v1661_v53, %v563_v8  ;;  %v1288_v48 = vsel %vm753_vm10, 1.0, %v1474_v0 }
 0x1ca   : > { %v1364_v35 = vpop.eup %1363 }
 0x1cb   : > { %v591_v38 = vrot.slane %v1364_v35, %v504_v43 }
 0x1cd   : > { %v592_v44 = vmul.f32 %v591_v38, %v553_v11  ;;  %v1704_v45 = vmul.f32 %v741_v39, %v591_v38  ;;  %v518_v11 = vmul.f32 %v1638_v31, %v1622_v25 }
 0x1cf   : > { %v1707_v47 = vmul.f32 %v1279_v40, %v592_v44  ;;  %881 = vxpose.xlu1.b32.start.end [1/1] (short) (narrow) %v1704_v45, 8 }
 0x1d1   : > { %v597_v49 = vrot.slane %v1707_v47, %v510_v30  ;;  %v621_v43 = vrot.slane %v1707_v47, %v1627_v27  ;;  %v615_v50 = vrot.slane %v1707_v47, %v1630_v28  ;;  %v603_v26 = vrot.slane %v1707_v47, %v1620_v24 }
 0x1d2   : > { %v609_v46 = vrot.slane %v1707_v47, %v1617_v23 }
 0x1d3   : > { %v598_v52 = vmul.f32 %v597_v49, %v1707_v47  ;;  %v622_v54 = vmul.f32 %v621_v43, %v1707_v47  ;;  %v801_v55 = vmul.f32 %v1704_v45, %v621_v43  ;;  %v1720_v58 = vmul.f32 %v615_v50, %v1707_v47 }
 0x1d4   : > { %v785_v61 = vmul.f32 %v1704_v45, %v615_v50  ;;  %v749_v4 = vmul.f32 %v1704_v45, %v597_v49  ;;  %v604_v21 = vmul.f32 %v603_v26, %v1707_v47  ;;  %v759_v39 = vmul.f32 %v1704_v45, %v603_v26 }
 0x1d5   : > { %v599_v59 = vsub.f32 %v559_v51, %v598_v52  ;;  %v623_v42 = vsub.f32 %v1687_v14, %v622_v54  ;;  %v802_v60 = vadd.f32 %v801_v55, %v800_v19  ;;  %v617_v62 = vsub.f32 %v1692_v20, %v1720_v58 }
 0x1d6   : > { %v1726_v63 = vadd.f32 %v785_v61, %v784_v22  ;;  %v750_v6 = vadd.f32 %v749_v4, %v748_v5  ;;  %v519_v22 = vsub.f32 %v1665_v56, %v518_v11  ;;  %v758_v56 = vadd.f32 %v757_v57, %v1648_v37 }
 0x1d7   : > { %1365 = vrsqrt.f32 %v599_v59  ;;  %v610_v51 = vmul.f32 %v609_v46, %v1707_v47  ;;  %v771_v52 = vmul.f32 %v1704_v45, %v609_v46  ;;  %v1281_v54 = vsel %vm659_vm11, 1.0, %v1474_v0 }
 0x1d8   : > { %v751_v14 = vsub.f32 %v1287_v7, %v750_v6  ;;  %v760_v41 = vadd.f32 %v759_v39, %v758_v56  ;;  %v1289_v20 = vsel %vm765_vm12, 1.0, %v1474_v0  ;;  %v1283_v46 = vsel %vm709_vm15, 1.0, %v1474_v0 }
 0x1d9   : > { %v611_v2 = vsub.f32 %v1683_v12, %v610_v51  ;;  %v772_v4 = vadd.f32 %v771_v52, %v1685_v13 }
 0x1e1   : > { %v1366_v9 = vpop.eup %1365 }
 0x1e2   : > { %v631_v10 = vrot.slane %v1366_v9, %v510_v30  ;;  %v565_v30 = vsub.f32 %v519_v22, %v564_v17  ;;  %v1282_v22 = vsel %vm687_vm13, 1.0, %v1474_v0 }
 0x1e4   : > { %v632_v16 = vmul.f32 %v631_v10, %v599_v59  ;;  %v752_v18 = vmul.f32 %v751_v14, %v631_v10  ;;  %v605_v32 = vsub.f32 %v565_v30, %v604_v21 }
 0x1e6   : > { %v633_v19 = vmul.f32 %v1280_v15, %v632_v16  ;;  %913 = vxpose.xlu1.b32.start.end [1/1] (short) (narrow) %v752_v18, 8 }
 0x1e8   : > { %v637_v29 = vrot.slane %v633_v19, %v1620_v24  ;;  %v655_v25 = vrot.slane %v633_v19, %v1627_v27  ;;  %v643_v53 = vrot.slane %v633_v19, %v1617_v23  ;;  %v649_v43 = vrot.slane %v633_v19, %v1630_v28 }
 0x1ea   : > { %v638_v31 = vmul.f32 %v637_v29, %v633_v19  ;;  %v656_v33 = vmul.f32 %v655_v25, %v633_v19  ;;  %v803_v34 = vmul.f32 %v752_v18, %v655_v25  ;;  %v761_v40 = vmul.f32 %v752_v18, %v637_v29 }
 0x1eb   : > { %v773_v61 = vmul.f32 %v752_v18, %v643_v53  ;;  %v787_v5 = vmul.f32 %v752_v18, %v649_v43 }
 0x1ec   : > { %v639_v35 = vsub.f32 %v605_v32, %v638_v31  ;;  %v1746_v36 = vsub.f32 %v623_v42, %v656_v33  ;;  %v804_v38 = vadd.f32 %v803_v34, %v802_v60  ;;  %v762_v44 = vadd.f32 %v761_v40, %v760_v41 }
 0x1ed   : > { %v644_v42 = vmul.f32 %v643_v53, %v633_v19  ;;  %v650_v60 = vmul.f32 %v649_v43, %v633_v19  ;;  %v774_v8 = vadd.f32 %v773_v61, %v772_v4  ;;  %v788_v12 = vadd.f32 %v787_v5, %v1726_v63 }
 0x1ee   : > { %1367 = vrsqrt.f32 %v639_v35  ;;  %v763_v37 = vsub.f32 %v1288_v48, %v762_v44 }
 0x1ef   : > { %v645_v6 = vsub.f32 %v611_v2, %v644_v42  ;;  %v651_v7 = vsub.f32 %v617_v62, %v650_v60 }
 0x1f8   : > { %v1368_v49 = vpop.eup %1367 }
 0x1f9   : > { %v665_v50 = vrot.slane %v1368_v49, %v1620_v24 }
 0x1fb   : > { %v666_v55 = vmul.f32 %v665_v50, %v639_v35  ;;  %v764_v59 = vmul.f32 %v763_v37, %v665_v50 }
 0x1fd   : > { %v667_v1 = vmul.f32 %v1281_v54, %v666_v55  ;;  %945 = vxpose.xlu0.b32.start.end [1/1] (short) (narrow) %v764_v59, 8  ;;  %v1291_v54 = vsel %vm795_vm0, 1.0, %v1474_v0 }
 0x1ff   : > { %v683_v24 = vrot.slane %v667_v1, %v1627_v27  ;;  %v677_v47 = vrot.slane %v667_v1, %v1630_v28  ;;  %v671_v45 = vrot.slane %v667_v1, %v1617_v23 }
 0x201   : > { %v684_v9 = vmul.f32 %v683_v24, %v667_v1  ;;  %v678_v10 = vmul.f32 %v677_v47, %v667_v1  ;;  %v672_v11 = vmul.f32 %v671_v45, %v667_v1  ;;  %v775_v26 = vmul.f32 %v764_v59, %v671_v45 }
 0x202   : > { %v789_v13 = vmul.f32 %v764_v59, %v677_v47  ;;  %v805_v14 = vmul.f32 %v764_v59, %v683_v24 }
 0x203   : > { %v685_v15 = vsub.f32 %v1746_v36, %v684_v9  ;;  %v679_v16 = vsub.f32 %v651_v7, %v678_v10  ;;  %v673_v17 = vsub.f32 %v645_v6, %v672_v11  ;;  %v776_v18 = vadd.f32 %v775_v26, %v774_v8 }
 0x204   : > { %v790_v19 = vadd.f32 %v789_v13, %v788_v12  ;;  %v806_v21 = vadd.f32 %v805_v14, %v804_v38 }
 0x205   : > { %1369 = vrsqrt.f32 %v673_v17  ;;  %v777_v63 = vsub.f32 %v1289_v20, %v776_v18 }
 0x20f   : > { %v1370_v58 = vpop.eup %1369 }
 0x210   : > { %v693_v62 = vrot.slane %v1370_v58, %v1617_v23  ;;  %v1290_v23 = vsel %vm779_vm14, 1.0, %v1474_v0 }
 0x212   : > { %v778_v29 = vmul.f32 %v777_v63, %v693_v62  ;;  %v694_v30 = vmul.f32 %v693_v62, %v673_v17 }
 0x214   : > { %977 = vxpose.xlu1.b32.start.end [1/1] (short) (narrow) %v778_v29, 8  ;;  %v695_v25 = vmul.f32 %v1282_v22, %v694_v30 }
 0x216   : > { %v705_v31 = vrot.slane %v695_v25, %v1627_v27  ;;  %v699_v32 = vrot.slane %v695_v25, %v1630_v28 }
 0x218   : > { %v706_v33 = vmul.f32 %v705_v31, %v695_v25  ;;  %v807_v34 = vmul.f32 %v778_v29, %v705_v31  ;;  %v700_v35 = vmul.f32 %v699_v32, %v695_v25  ;;  %v791_v36 = vmul.f32 %v778_v29, %v699_v32 }
 0x21a   : > { %v701_v57 = vsub.f32 %v679_v16, %v700_v35  ;;  %v707_v38 = vsub.f32 %v685_v15, %v706_v33  ;;  %v792_v39 = vadd.f32 %v791_v36, %v790_v19  ;;  %v808_v56 = vadd.f32 %v807_v34, %v806_v21 }
 0x21c   : > { %1371 = vrsqrt.f32 %v701_v57  ;;  %v793_v44 = vsub.f32 %v1290_v23, %v792_v39 }
 0x223   : > { %v833_v60 = vpop.trf.xlu0 }
 0x226   : > { %v1372_v40 = vpop.eup %1371 }
 0x227   : > { %v715_v41 = vrot.slane %v1372_v40, %v1630_v28 }
 0x229   : > { %v794_v48 = vmul.f32 %v793_v44, %v715_v41  ;;  %v716_v49 = vmul.f32 %v715_v41, %v701_v57 }
 0x22b   : > { %1009 = vxpose.xlu0.b32.start.end [1/1] (short) (narrow) %v794_v48, 8  ;;  %v717_v53 = vmul.f32 %v1283_v46, %v716_v49 }
 0x22d   : > { %v721_v43 = vrot.slane %v717_v53, %v1627_v27 }
 0x22f   : > { %v722_v50 = vmul.f32 %v721_v43, %v717_v53  ;;  %v809_v37 = vmul.f32 %v794_v48, %v721_v43 }
 0x231   : > { %v723_v51 = vsub.f32 %v707_v38, %v722_v50  ;;  %v810_v52 = vadd.f32 %v809_v37, %v808_v56 }
 0x233   : > { %1373 = vrsqrt.f32 %v723_v51  ;;  %v811_v28 = vsub.f32 %v1291_v54, %v810_v52 }
 0x238   : > { %v865_v1 = vpop.trf.xlu0 }
 0x239   : > { %v1074_v2 = vrot.slane %v865_v1, 7 }
 0x23b   : > { %v1095_v24 = vsel %vm1094_vm2, %v833_v60, %v1074_v2 }
 0x23d   : > { %v1374_v55 = vpop.eup %1373 }
 0x23e   : > { %v815_v59 = vrot.slane %v1374_v55, %v1627_v27 }
 0x240   : > { %v816_v42 = vmul.f32 %v815_v59, %v811_v28 }
 0x242   : > { %1041 = vxpose.xlu1.b32.start.end [1/1] (short) (narrow) %v816_v42, 8 }
 0x24f   : > { %v897_v61 = vpop.trf.xlu1 }
 0x250   : > { %v1077_v4 = vrot.slane %v897_v61, 6 }
 0x252   : > { %v1097_v3 = vsel %vm1096_vm3, %v1095_v24, %v1077_v4 }
 0x266   : > { %v929_v5 = vpop.trf.xlu1 }
 0x267   : > { %v1080_v47 = vrot.slane %v929_v5, 5 }
 0x269   : > { %v1099_v7 = vsel %vm1098_vm4, %v1097_v3, %v1080_v47 }
 0x27d   : > { %v961_v45 = vpop.trf.xlu0 }
 0x27e   : > { %v1083_v0 = vrot.slane %v961_v45, 4 }
 0x280   : > { %v1101_v9 = vsel %vm1100_vm5, %v1099_v7, %v1083_v0 }
 0x294   : > { %v993_v6 = vpop.trf.xlu1 }
 0x295   : > { %v1086_v27 = vrot.slane %v993_v6, 3 }
 0x297   : > { %v1103_v11 = vsel %vm1102_vm6, %v1101_v9, %v1086_v27 }
 0x2ab   : > { %v1025_v8 = vpop.trf.xlu0 }
 0x2ac   : > { %v1089_v10 = vrot.slane %v1025_v8, 2 }
 0x2ae   : > { %v1105_v13 = vsel %vm1104_vm7, %v1103_v11, %v1089_v10 }
 0x2c2   : > { %v1057_v26 = vpop.trf.xlu1 }
 0x2c3   : > { %v1092_v12 = vrot.slane %v1057_v26, 1 }
 0x2c5   : > { %v1107_v14 = vsel %vm1106_vm8, %v1105_v13, %v1092_v12 }
 0x2c6   : > { %1309 = vmatmul.mubr.msk.f32.vlgmr.msra.gmra.mrb[0].mxu1 %vm1108_vm9, %v1107_v14 }
 0x399   : > { %v1178_v15 = vpop.f32.mrb[0].mxu1 }
 0x39a   : > { %1182 = vst.msk [vmem:[%s131_s25] sm:$0xff] %vm141_vm1, %v1178_v15  ;;  %v1310_v16 = vpop.f32.mrb[1].mxu1 }
 0x39b   : > { %1418 = shalt.err (!%p1415_p4)
}
 0x39c   : > { %s1419_s5 = scalar_lea.hbm %s1794_s29, 128  ;;  %s1423_s14 = scalar_lea.hbm %s1840_s1, 256 }
 0x39d   : > { %p1420_p5 = scmp.ne.s32.totalorder %s1794_s29, %s1419_s5  ;;  %p1424_p0 = scmp.lt.u32.totalorder %s1794_s29, %s1840_s1 }
 0x39e   : > { %p1425_p1 = scmp.lt.u32.totalorder %s1423_s14, %s1419_s5  ;;  %p1427_p6 = scmp.lt.u32.totalorder %s1419_s5, %s1794_s29 }
 0x39f   : > { %p1421_p8 = pnand %p1420_p5, %p1849_p11 }
 0x3a0   : > { %p1426_p3 = por %p1425_p1, %p1424_p0 }
 0x3a1   : > { %p1422_p9 = pneg %p1421_p8 }
 0x3a2   : > { %p1428_p12 = por %p1427_p6, %p1426_p3 }
 0x3a4   : > { %p1429_p13 = pnand %p1428_p12, %p1422_p9 }
 0x3a6   : > { %1432 = shalt.err (!%p1429_p13)
}
 0x3a7   : > { %1313 = dma.vmem_to_hbm [thread:$0]  (%p1849_p11), %s1796_s26, 128, %s1794_s29, %s1184_s30  }
 0x3a8 PF: > { %s1209_s21 = sand.u32 1, %s1459_s6   ;;  %p1850_p7 = scmp.ne.s32.totalorder %s1845_s19, 0 }
 0x3a9   : > { %p1851_p10 = scmp.ge.s32.totalorder %s1471_s9, 2  ;;  %s1210_s22 = scalar_lea.sflag [#allocation4], %s1209_s21 }
 0x3ab   : > { %p1320_p2 = pnand %p1851_p10, %p1850_p7 }
 0x3ad   : > { %1454 = dma.done.wait (!%p1320_p2), %s1210_s22, 128  }
 0x3ae   : > { %1456 = vsyncadd (!%p1320_p2), %s1210_s22, 4294967168  ;;  %p14_p4 = scmp.ge.s32.totalorder %s1512_s12, 4   ;;  %s1852_s6 = smov %s1463_s7 }
 0x3af   : > { %s1853_s7 = smov %s1467_s8  ;;  %s1854_s8 = smov %s1524_s15 }
 0x3b0   : > { %s1855_s9 = smov %s1512_s12  ;;  %16 = sbr.rel (!%p14_p4) target bundleno = 5 (0x5), region = 69 }
 0x3b7   :  { %1215 = vsyncpa [#allocation3], 1 }
 0x3b8   :  { %1217 = vsyncpa [#allocation3 + $0x1], 1 }
 0x3b9   :  { %1218 = vsyncpa [#allocation4], 1 }
 0x3ba   :  { %1220 = vsyncpa [#allocation4 + $0x1], 1 }

</bundles_post_ra>
